<compile_context>
chip_gen: v6e
topology: v6e:2x2x1
jax: 0.10.0
libtpu: 0.0.40
codegen_flags: <defaults>
</compile_context>

<pallas_src>
import functools

import jax
import jax.numpy as jnp
from jax.experimental import pallas as pl
from jax.experimental.pallas import tpu as pltpu

HIDDEN = 128  # fixed by the nn.Module definition


def _round_up(n, m):
    return ((n + m - 1) // m) * m


def cvae_kernel(
    xc_ref, eps_ref,                                           # batch-tiled activations
    w1_ref, wmulv_ref, wdec_z_ref, wdec_c_ref, wout_ref, b_ref,  # VMEM-resident weights
    out_ref,                                                   # packed [recon | mu | logvar]
    *, input_dim, cond_dim, latent_dim, hidden, mxu_dtype,
):
    xc = xc_ref[...]                        # (tb, input_dim + cond_dim), f32
    eps = eps_ref[...]                      # (tb, latent_dim), f32

    # Biases: rows of one packed slab, each zero-padded to a common lane width.
    b1 = b_ref[0:1, :hidden]
    b_mulv = b_ref[1:2, :2 * latent_dim]
    b_dec = b_ref[2:3, :hidden]
    b_out = b_ref[3:4, :input_dim]

    # MXU operands in bf16 (f32 accumulation); VPU/EUP math stays f32.
    xc_m = xc.astype(mxu_dtype)
    c_m = xc_m[:, input_dim:]               # (tb, cond_dim), static lane slice

    # ---- decoder cond-contribution, hoisted: depends only on xc, so it is an
    #      independent MXU push that overlaps with fc1 (replaces zc scratch) ----
    c_dec = jnp.dot(c_m, wdec_c_ref[...], preferred_element_type=jnp.float32)

    # ---- encode: h = relu(fc1([x|c])) -> single MXU push, K = in+cond ----
    h = jnp.dot(xc_m, w1_ref[...], preferred_element_type=jnp.float32) + b1
    h = jnp.maximum(h, 0.0)

    # ---- fused fc_mu | fc_logvar -> single MXU push, N = 2*latent ----
    mulv = jnp.dot(h.astype(mxu_dtype), wmulv_ref[...],
                   preferred_element_type=jnp.float32) + b_mulv
    mu = mulv[:, :latent_dim]
    logvar = mulv[:, latent_dim:]

    # ---- reparameterization (f32): z = mu + eps * exp(0.5 * logvar) ----
    z = mu + eps * jnp.exp(0.5 * logvar)

    # ---- decode: z-part push + hoisted c-part, no VMEM scratch round-trip ----
    hd = (jnp.dot(z.astype(mxu_dtype), wdec_z_ref[...],
                  preferred_element_type=jnp.float32) + c_dec + b_dec)
    hd = jnp.maximum(hd, 0.0)
    recon = jnp.dot(hd.astype(mxu_dtype), wout_ref[...],
                    preferred_element_type=jnp.float32) + b_out

    # ---- single lane-dense store of the packed output slab ----
    out_ref[...] = jnp.concatenate([recon, mulv], axis=-1)


def cvae_forward(x, c, eps, params, *, block_b=2048, mxu_dtype=jnp.bfloat16):
    """Full CVAE forward in one pallas_call with a 1-D batch grid."""
    B, input_dim = x.shape
    cond_dim = c.shape[1]
    latent_dim = eps.shape[1]
    hidden = params["w1"].shape[1]
    bias_w = params["b_all"].shape[1]

    # [x|c] concat happens once outside the kernel (cheap XLA op).
    xc = jnp.concatenate([x, c], axis=1).astype(jnp.float32)
    eps = eps.astype(jnp.float32)

    # Batch tile: as large as block_b allows (amortizes ~0.35 us/step overhead),
    # but sized so the grid has >= 2 steps -> the "parallel" axis can shard
    # across v7x's two TensorCores.  Rows stay a multiple of 8 (f32 tiles).
    tb = min(block_b, max(8, _round_up(pl.cdiv(B, 2), 8)))
    Bp = _round_up(B, tb)
    if Bp // tb < 2:
        Bp = 2 * tb                      # padded rows are benign and sliced off
    if Bp != B:
        pad = Bp - B
        xc = jnp.pad(xc, ((0, pad), (0, 0)))
        eps = jnp.pad(eps, ((0, pad), (0, 0)))

    # Weight matrices shipped to VMEM in the MXU dtype (halves weight DMA/VMEM
    # when bf16); biases stay f32.  Decoder weight is split so the c-term can
    # be hoisted in the kernel.
    w1 = params["w1"].astype(mxu_dtype)
    wmulv = params["wmulv"].astype(mxu_dtype)
    wdec_z = params["wdec"][:latent_dim].astype(mxu_dtype)
    wdec_c = params["wdec"][latent_dim:].astype(mxu_dtype)
    wout = params["wout"].astype(mxu_dtype)
    b_all = params["b_all"].astype(jnp.float32)

    out_w = input_dim + 2 * latent_dim
    w_bytes = 2 if mxu_dtype == jnp.bfloat16 else 4

    flops = 2 * Bp * ((input_dim + cond_dim) * hidden        # fc1
                      + hidden * 2 * latent_dim              # fc_mu | fc_logvar
                      + cond_dim * hidden                     # decoder c-term
                      + latent_dim * hidden                   # decoder z-term
                      + hidden * input_dim)                   # fc_out
    bytes_accessed = (xc.size * 4 + eps.size * 4 + Bp * out_w * 4
                      + (w1.size + wmulv.size + wdec_z.size + wdec_c.size + wout.size) * w_bytes
                      + b_all.size * 4)

    kernel = functools.partial(
        cvae_kernel,
        input_dim=input_dim, cond_dim=cond_dim,
        latent_dim=latent_dim, hidden=hidden, mxu_dtype=mxu_dtype,
    )

    out = pl.pallas_call(
        kernel,
        out_shape=jax.ShapeDtypeStruct((Bp, out_w), jnp.float32),
        grid_spec=pltpu.PrefetchScalarGridSpec(
            num_scalar_prefetch=0,
            grid=(Bp // tb,),
            in_specs=[
                # batch-tiled activations
                pl.BlockSpec((tb, input_dim + cond_dim), lambda i: (i, 0)),
                pl.BlockSpec((tb, latent_dim), lambda i: (i, 0)),
                # weights: constant index_map -> DMA'd once, VMEM-resident
                pl.BlockSpec((input_dim + cond_dim, hidden), lambda i: (0, 0)),
                pl.BlockSpec((hidden, 2 * latent_dim), lambda i: (0, 0)),
                pl.BlockSpec((latent_dim, hidden), lambda i: (0, 0)),
                pl.BlockSpec((cond_dim, hidden), lambda i: (0, 0)),
                pl.BlockSpec((hidden, input_dim), lambda i: (0, 0)),
                pl.BlockSpec((4, bias_w), lambda i: (0, 0)),
            ],
            out_specs=pl.BlockSpec((tb, out_w), lambda i: (i, 0)),
        ),
        compiler_params=pltpu.CompilerParams(
            dimension_semantics=("parallel",),   # shards batch tiles across TCs
        ),
        cost_estimate=pl.CostEstimate(
            flops=flops,
            transcendentals=Bp * latent_dim,
            bytes_accessed=bytes_accessed,
        ),
    )(xc, eps, w1, wmulv, wdec_z, wdec_c, wout, b_all)

    out = out[:B]
    recon = out[:, :input_dim]
    mu = out[:, input_dim:input_dim + latent_dim]
    logvar = out[:, input_dim + latent_dim:]
    return recon, mu, logvar


def init_params(key, input_dim, cond_dim, latent_dim, hidden=HIDDEN):
    """Deterministic synthetic weights, pre-packed for the kernel."""
    ks = jax.random.split(key, 6)
    scale = 0.05

    def w(k, shape):
        return scale * jax.random.normal(k, shape, dtype=jnp.float32)

    # fc1: Linear(input_dim + cond_dim, hidden)      (stored as [in, out])
    w1 = w(ks[0], (input_dim + cond_dim, hidden))
    b1 = w(ks[1], (hidden,))
    # fc_mu | fc_logvar fused: (hidden, 2*latent)
    wmulv = w(ks[2], (hidden, 2 * latent_dim))
    bmulv = w(ks[3], (2 * latent_dim,))
    # fc_dec: Linear(latent + cond, hidden)
    wdec = w(ks[4], (latent_dim + cond_dim, hidden))
    bdec = jnp.zeros((hidden,), jnp.float32)
    # fc_out: Linear(hidden, input_dim)
    wout = w(ks[5], (hidden, input_dim))
    bout = jnp.zeros((input_dim,), jnp.float32)

    # One bias slab: 4 rows [b1, bmu|blv, bdec, bout], zero-padded to a common width.
    bias_w = max(hidden, 2 * latent_dim, input_dim)

    def row(v):
        return jnp.pad(v, (0, bias_w - v.shape[0]))[None, :]

    b_all = jnp.concatenate([row(b1), row(bmulv), row(bdec), row(bout)], axis=0)

    return {"w1": w1, "wmulv": wmulv, "wdec": wdec, "wout": wout, "b_all": b_all}


def reference_forward(x, c, eps, p):
    """Plain-JAX f32 reference (same packed params) for correctness checking."""
    input_dim = x.shape[1]
    latent_dim = eps.shape[1]
    hidden = p["w1"].shape[1]
    b = p["b_all"]
    xc = jnp.concatenate([x, c], axis=1)
    h = jax.nn.relu(xc @ p["w1"] + b[0, :hidden])
    mulv = h @ p["wmulv"] + b[1, :2 * latent_dim]
    mu = mulv[:, :latent_dim]
    logvar = mulv[:, latent_dim:]
    z = mu + eps * jnp.exp(0.5 * logvar)
    zc = jnp.concatenate([z, c], axis=1)
    hd = jax.nn.relu(zc @ p["wdec"] + b[2, :hidden])
    recon = hd @ p["wout"] + b[3, :input_dim]
    return recon, mu, logvar


if __name__ == "__main__":
    # Small tabular shapes consistent with the module.
    B, INPUT_DIM, COND_DIM, LATENT_DIM = 8, 32, 8, 16

    root = jax.random.PRNGKey(0)
    k_x, k_c, k_eps, k_params = jax.random.split(root, 4)

    x = jax.random.normal(k_x, (B, INPUT_DIM), dtype=jnp.float32)
    c = jax.random.normal(k_c, (B, COND_DIM), dtype=jnp.float32)
    eps = jax.random.normal(k_eps, (B, LATENT_DIM), dtype=jnp.float32)

    params = init_params(k_params, INPUT_DIM, COND_DIM, LATENT_DIM)

    r_ref, mu_ref, lv_ref = reference_forward(x, c, eps, params)

    # Default (performance) path: bf16 MXU operands, f32 accumulation.
    recon, mu, logvar = cvae_forward(x, c, eps, params)
    jax.block_until_ready((recon, mu, logvar))
    assert recon.shape == (B, INPUT_DIM)
    assert mu.shape == (B, LATENT_DIM)
    assert logvar.shape == (B, LATENT_DIM)
    assert jnp.allclose(recon, r_ref, atol=2e-2, rtol=2e-2)
    assert jnp.allclose(mu, mu_ref, atol=2e-2, rtol=2e-2)
    assert jnp.allclose(logvar, lv_ref, atol=2e-2, rtol=2e-2)

    # Exact path (f32 MXU operands) for a tight numerical check.
    recon32, mu32, lv32 = cvae_forward(x, c, eps, params, mxu_dtype=jnp.float32)
    jax.block_until_ready((recon32, mu32, lv32))
    assert jnp.allclose(recon32, r_ref, atol=1e-5, rtol=1e-5)
    assert jnp.allclose(mu32, mu_ref, atol=1e-5, rtol=1e-5)
    assert jnp.allclose(lv32, lv_ref, atol=1e-5, rtol=1e-5)

    print("KERNEL_OK")
</pallas_src>

<mosaic_0001>
module attributes {stable_mosaic.version = 11 : i64} {
  func.func @cvae_kernel(%arg0: i32, %arg1: memref<8x40xf32, #tpu.memory_space<vmem>>, %arg2: memref<8x16xf32, #tpu.memory_space<vmem>>, %arg3: memref<40x128xbf16, #tpu.memory_space<vmem>>, %arg4: memref<128x32xbf16, #tpu.memory_space<vmem>>, %arg5: memref<16x128xbf16, #tpu.memory_space<vmem>>, %arg6: memref<8x128xbf16, #tpu.memory_space<vmem>>, %arg7: memref<128x32xbf16, #tpu.memory_space<vmem>>, %arg8: memref<4x128xf32, #tpu.memory_space<vmem>>, %arg9: memref<8x64xf32, #tpu.memory_space<vmem>>) attributes {dimension_semantics = [#tpu.dimension_semantics<parallel>], iteration_bounds = array<i64: 2>, scalar_prefetch = 0 : i64, scratch_operands = 0 : i64, tpu.core_type = #tpu.core_type<tc>, window_params = [{transform_indices = @transform_0, window_bounds = array<i64: 8, 40>}, {transform_indices = @transform_1, window_bounds = array<i64: 8, 16>}, {pipeline_mode = #tpu.pipeline_mode<synchronous>, transform_indices = @transform_2, window_bounds = array<i64: 40, 128>}, {pipeline_mode = #tpu.pipeline_mode<synchronous>, transform_indices = @transform_3, window_bounds = array<i64: 128, 32>}, {pipeline_mode = #tpu.pipeline_mode<synchronous>, transform_indices = @transform_4, window_bounds = array<i64: 16, 128>}, {pipeline_mode = #tpu.pipeline_mode<synchronous>, transform_indices = @transform_5, window_bounds = array<i64: 8, 128>}, {pipeline_mode = #tpu.pipeline_mode<synchronous>, transform_indices = @transform_6, window_bounds = array<i64: 128, 32>}, {pipeline_mode = #tpu.pipeline_mode<synchronous>, transform_indices = @transform_7, window_bounds = array<i64: 4, 128>}, {transform_indices = @transform_8, window_bounds = array<i64: 8, 64>}]} {
    %c0 = arith.constant 0 : index
    %c0_0 = arith.constant 0 : index
    %0 = vector.load %arg1[%c0, %c0_0] : memref<8x40xf32, #tpu.memory_space<vmem>>, vector<8x40xf32>
    %c0_1 = arith.constant 0 : index
    %c0_2 = arith.constant 0 : index
    %1 = vector.load %arg2[%c0_1, %c0_2] : memref<8x16xf32, #tpu.memory_space<vmem>>, vector<8x16xf32>
    %c0_3 = arith.constant 0 : index
    %c0_4 = arith.constant 0 : index
    %2 = vector.load %arg8[%c0_3, %c0_4] : memref<4x128xf32, #tpu.memory_space<vmem>>, vector<1x128xf32>
    %c1 = arith.constant 1 : index
    %c0_5 = arith.constant 0 : index
    %3 = vector.load %arg8[%c1, %c0_5] : memref<4x128xf32, #tpu.memory_space<vmem>>, vector<1x32xf32>
    %c2 = arith.constant 2 : index
    %c0_6 = arith.constant 0 : index
    %4 = vector.load %arg8[%c2, %c0_6] : memref<4x128xf32, #tpu.memory_space<vmem>>, vector<1x128xf32>
    %c3 = arith.constant 3 : index
    %c0_7 = arith.constant 0 : index
    %5 = vector.load %arg8[%c3, %c0_7] : memref<4x128xf32, #tpu.memory_space<vmem>>, vector<1x32xf32>
    %6 = arith.truncf %0 : vector<8x40xf32> to vector<8x40xbf16>
    %7 = vector.extract_strided_slice %6 {offsets = [0, 32], sizes = [8, 8], strides = [1, 1]} : vector<8x40xbf16> to vector<8x8xbf16>
    %c0_8 = arith.constant 0 : index
    %c0_9 = arith.constant 0 : index
    %8 = vector.load %arg6[%c0_8, %c0_9] : memref<8x128xbf16, #tpu.memory_space<vmem>>, vector<8x128xbf16>
    %cst = arith.constant dense<0.000000e+00> : vector<8x128xf32>
    %9 = tpu.matmul %7, %8, %cst {dimension_numbers = #tpu.dot_dimension_numbers<[1], [0], [0], [1], [0, 0, 1, 1], [], []>} : vector<8x8xbf16>, vector<8x128xbf16>, vector<8x128xf32> -> vector<8x128xf32>
    %c0_10 = arith.constant 0 : index
    %c0_11 = arith.constant 0 : index
    %10 = vector.load %arg3[%c0_10, %c0_11] : memref<40x128xbf16, #tpu.memory_space<vmem>>, vector<40x128xbf16>
    %cst_12 = arith.constant dense<0.000000e+00> : vector<8x128xf32>
    %11 = tpu.matmul %6, %10, %cst_12 {dimension_numbers = #tpu.dot_dimension_numbers<[1], [0], [0], [1], [0, 0, 1, 1], [], []>} : vector<8x40xbf16>, vector<40x128xbf16>, vector<8x128xf32> -> vector<8x128xf32>
    %12 = vector.broadcast %2 : vector<1x128xf32> to vector<8x128xf32>
    %13 = arith.addf %11, %12 : vector<8x128xf32>
    %cst_13 = arith.constant 0.000000e+00 : f32
    %14 = vector.broadcast %cst_13 : f32 to vector<8x128xf32>
    %15 = arith.maximumf %13, %14 : vector<8x128xf32>
    %16 = arith.truncf %15 : vector<8x128xf32> to vector<8x128xbf16>
    %c0_14 = arith.constant 0 : index
    %c0_15 = arith.constant 0 : index
    %17 = vector.load %arg4[%c0_14, %c0_15] : memref<128x32xbf16, #tpu.memory_space<vmem>>, vector<128x32xbf16>
    %cst_16 = arith.constant dense<0.000000e+00> : vector<8x32xf32>
    %18 = tpu.matmul %16, %17, %cst_16 {dimension_numbers = #tpu.dot_dimension_numbers<[1], [0], [0], [1], [0, 0, 1, 1], [], []>} : vector<8x128xbf16>, vector<128x32xbf16>, vector<8x32xf32> -> vector<8x32xf32>
    %19 = vector.broadcast %3 : vector<1x32xf32> to vector<8x32xf32>
    %20 = arith.addf %18, %19 : vector<8x32xf32>
    %21 = vector.extract_strided_slice %20 {offsets = [0, 0], sizes = [8, 16], strides = [1, 1]} : vector<8x32xf32> to vector<8x16xf32>
    %22 = vector.extract_strided_slice %20 {offsets = [0, 16], sizes = [8, 16], strides = [1, 1]} : vector<8x32xf32> to vector<8x16xf32>
    %cst_17 = arith.constant 5.000000e-01 : f32
    %23 = vector.broadcast %cst_17 : f32 to vector<8x16xf32>
    %24 = arith.mulf %23, %22 : vector<8x16xf32>
    %25 = math.exp %24 : vector<8x16xf32>
    %26 = arith.mulf %1, %25 : vector<8x16xf32>
    %27 = arith.addf %21, %26 : vector<8x16xf32>
    %28 = arith.truncf %27 : vector<8x16xf32> to vector<8x16xbf16>
    %c0_18 = arith.constant 0 : index
    %c0_19 = arith.constant 0 : index
    %29 = vector.load %arg5[%c0_18, %c0_19] : memref<16x128xbf16, #tpu.memory_space<vmem>>, vector<16x128xbf16>
    %cst_20 = arith.constant dense<0.000000e+00> : vector<8x128xf32>
    %30 = tpu.matmul %28, %29, %cst_20 {dimension_numbers = #tpu.dot_dimension_numbers<[1], [0], [0], [1], [0, 0, 1, 1], [], []>} : vector<8x16xbf16>, vector<16x128xbf16>, vector<8x128xf32> -> vector<8x128xf32>
    %31 = arith.addf %30, %9 : vector<8x128xf32>
    %32 = vector.broadcast %4 : vector<1x128xf32> to vector<8x128xf32>
    %33 = arith.addf %31, %32 : vector<8x128xf32>
    %cst_21 = arith.constant 0.000000e+00 : f32
    %34 = vector.broadcast %cst_21 : f32 to vector<8x128xf32>
    %35 = arith.maximumf %33, %34 : vector<8x128xf32>
    %36 = arith.truncf %35 : vector<8x128xf32> to vector<8x128xbf16>
    %c0_22 = arith.constant 0 : index
    %c0_23 = arith.constant 0 : index
    %37 = vector.load %arg7[%c0_22, %c0_23] : memref<128x32xbf16, #tpu.memory_space<vmem>>, vector<128x32xbf16>
    %cst_24 = arith.constant dense<0.000000e+00> : vector<8x32xf32>
    %38 = tpu.matmul %36, %37, %cst_24 {dimension_numbers = #tpu.dot_dimension_numbers<[1], [0], [0], [1], [0, 0, 1, 1], [], []>} : vector<8x128xbf16>, vector<128x32xbf16>, vector<8x32xf32> -> vector<8x32xf32>
    %39 = vector.broadcast %5 : vector<1x32xf32> to vector<8x32xf32>
    %40 = arith.addf %38, %39 : vector<8x32xf32>
    %41 = tpu.concatenate %40, %20 in 1 : vector<8x32xf32>, vector<8x32xf32> -> vector<8x64xf32>
    %c0_25 = arith.constant 0 : index
    %c0_26 = arith.constant 0 : index
    %42 = vector.load %arg9[%c0_25, %c0_26] : memref<8x64xf32, #tpu.memory_space<vmem>>, vector<8x64xf32>
    tpu.vector_store %arg9[%c0_25, %c0_26], %41 {strides = array<i32>} : memref<8x64xf32, #tpu.memory_space<vmem>>, vector<8x64xf32>,
    return
  }
  func.func @transform_0(%arg0: i32) -> (i32, i32) {
    %c0_i32 = arith.constant 0 : i32
    %c0_i32_0 = arith.constant 0 : i32
    return %arg0, %c0_i32 : i32, i32
  }
  func.func @transform_1(%arg0: i32) -> (i32, i32) {
    %c0_i32 = arith.constant 0 : i32
    %c0_i32_0 = arith.constant 0 : i32
    return %arg0, %c0_i32 : i32, i32
  }
  func.func @transform_2(%arg0: i32) -> (i32, i32) {
    %c0_i32 = arith.constant 0 : i32
    %c0_i32_0 = arith.constant 0 : i32
    %c0_i32_1 = arith.constant 0 : i32
    return %c0_i32, %c0_i32_0 : i32, i32
  }
  func.func @transform_3(%arg0: i32) -> (i32, i32) {
    %c0_i32 = arith.constant 0 : i32
    %c0_i32_0 = arith.constant 0 : i32
    %c0_i32_1 = arith.constant 0 : i32
    return %c0_i32, %c0_i32_0 : i32, i32
  }
  func.func @transform_4(%arg0: i32) -> (i32, i32) {
    %c0_i32 = arith.constant 0 : i32
    %c0_i32_0 = arith.constant 0 : i32
    %c0_i32_1 = arith.constant 0 : i32
    return %c0_i32, %c0_i32_0 : i32, i32
  }
  func.func @transform_5(%arg0: i32) -> (i32, i32) {
    %c0_i32 = arith.constant 0 : i32
    %c0_i32_0 = arith.constant 0 : i32
    %c0_i32_1 = arith.constant 0 : i32
    return %c0_i32, %c0_i32_0 : i32, i32
  }
  func.func @transform_6(%arg0: i32) -> (i32, i32) {
    %c0_i32 = arith.constant 0 : i32
    %c0_i32_0 = arith.constant 0 : i32
    %c0_i32_1 = arith.constant 0 : i32
    return %c0_i32, %c0_i32_0 : i32, i32
  }
  func.func @transform_7(%arg0: i32) -> (i32, i32) {
    %c0_i32 = arith.constant 0 : i32
    %c0_i32_0 = arith.constant 0 : i32
    %c0_i32_1 = arith.constant 0 : i32
    return %c0_i32, %c0_i32_0 : i32, i32
  }
  func.func @transform_8(%arg0: i32) -> (i32, i32) {
    %c0_i32 = arith.constant 0 : i32
    %c0_i32_0 = arith.constant 0 : i32
    return %arg0, %c0_i32 : i32, i32
  }
}

</mosaic_0001>

<bundles_post_ra>
// kernel: tpu_custom_call.1
= control target key start
LH: loop header
LB: loop body
LE: loop exit
PB: predicated region body
PF: predicated region fallthrough
CT: control target
= control target key end

     0   :  { %13 = vsyncpa [#allocation3], 0  ;;  %s1349_s0 = inlined_call_operand.vmem [shape: f32[16,40], index: 0, kind: input, shape index: {}]   ;;  %s1350_s1 = inlined_call_operand.vmem [shape: f32[16,16], index: 1, kind: input, shape index: {}]   ;;  %s1351_s2 = inlined_call_operand.vmem [shape: bf16[40,128], index: 2, kind: input, shape index: {}]   ;;  %s1352_s3 = inlined_call_operand.vmem [shape: bf16[128,32], index: 3, kind: input, shape index: {}]   ;;  %s1353_s4 = inlined_call_operand.vmem [shape: bf16[16,128], index: 4, kind: input, shape index: {}]   ;;  %s1354_s5 = inlined_call_operand.vmem [shape: bf16[8,128], index: 5, kind: input, shape index: {}]   ;;  %s1355_s6 = inlined_call_operand.vmem [shape: bf16[128,32], index: 6, kind: input, shape index: {}]   ;;  %s1356_s7 = inlined_call_operand.vmem [shape: f32[4,128], index: 7, kind: input, shape index: {}]   ;;  %s1357_s8 = inlined_call_operand.hbm [shape: f32[16,64], index: 8, kind: output, shape index: {}]  }
   0x1   :  { %15 = vsyncpa [#allocation3 + $0x1], 0  ;;  %s1134_s27 = smov 0   ;;  %s1136_s28 = smov 0  }
   0x2   :  { %s1138_s29 = smov 0   ;;  %s1140_s30 = smov 0  }
   0x3 LB: > { %s1155_s9 = sadd.s32 4294967295, %s1081_s30   ;;  %s829_s10 = sadd.s32 4294967294, %s1081_s30   ;;  %s1081_s30 = sphi %s1140_s30, %s1363_s30   ;;  %s1077_s29 = sphi %s1138_s29, %s1362_s29   ;;  %s1073_s28 = sphi %s1136_s28, %s1361_s28   ;;  %s1069_s27 = sphi %s1134_s27, %s1360_s27  }
   0x4   : > { %s1159_s11 = sadd.s32 1, %s1081_s30   ;;  %s206_s12 = sadd.s32 1, %s1077_s29 }
   0x5   : > { %s203_s13 = ssub.s32 %s1081_s30, %s1159_s11  ;;  %p216_p0 = scmp.ne.s32.totalorder %s1077_s29, %s1073_s28 }
   0x6   : > { %p204_p1 = scmp.eq.s32.totalorder %s203_s13, 0  ;;  %p217_p2 = scmp.eq.s32.totalorder %s1155_s9, 1 }
   0x7   : > { %p222_p3 = scmp.ne.s32.totalorder %s1073_s28, %s1069_s27  ;;  %p223_p4 = scmp.eq.s32.totalorder %s829_s10, 1 }
   0x8   : > { %s1170_s14 = scalar_select %p204_p1, %s1077_s29, %s206_s12  }
   0x9   : > { %p1172_p5 = por %p217_p2, %p216_p0  ;;  %p1176_p6 = por %p223_p4, %p222_p3 }
   0xa   : > { %p832_p7 = scmp.ge.s32.totalorder %s1081_s30, 1  ;;  %p273_p8 = scmp.lt.s32.totalorder %s1081_s30, 3 }
   0xc   : > { %p274_p9 = pnand %p832_p7, %p273_p8 }
   0xd   : > { %p310_p10 = scmp.lt.s32.totalorder (!%p274_p9), %s1155_s9, 1  ;;  %s1085_s17 = smov (!%p274_p9), 96  }
   0xe   : > { %277 = sbr.rel (%p274_p9) target bundleno = 976 (0x3d0), region = 52  ;;  %s1086_s18 = smov (!%p274_p9), 32  }
   0xf   : > { %s1087_s10 = smov (!%p274_p9), 112   ;;  %s864_s21 = sshll.u32 (!%p274_p9), %s1155_s9, 7 }
  0x13   : > { %vm334_vm0 = vcmask 1043456   ;;  %v999_v0 = vld [vmem:[%s1351_s2 + $0x10] ss:$0 sps:$4 sm:$0xff]   ;;  %v1083_v1 = vmov 0.0   ;;  %vm1084_vm1 = vmmov 0   ;;  %v1000_v3 = vld [vmem:[%s1351_s2 + $0x8] sm:$0xff]  }
  0x14   : > { %899 = vmatprep.subr.bf16.mxu1 %v1083_v1  ;;  %893 = vmatprep.subr.bf16.mxu0 %v1083_v1  ;;  %v407_v2 = vsel %vm334_vm0, %v999_v0, 0  ;;  %v326_v4 = vld [vmem:[%s1354_s5] sm:$0xf]  ;;  %s1200_s23 = scalar_select %p310_p10, %s1155_s9, 1  ;;  %vm402_vm2 = vcmask 326656   ;;  %vm330_vm3 = vcmask 64512  }
  0x15   : > { %905 = vmatprep.mubr.msk.bf16.mxu1 %vm1084_vm1, %v1083_v1  ;;  %895 = vmatprep.mubr.msk.bf16.mxu0 %vm1084_vm1, %v1083_v1  ;;  %v336_v5 = vsel %vm334_vm0, %v326_v4, 0  ;;  %v1001_v6 = vld [vmem:[%s1351_s2] sm:$0xff]   ;;  %v1002_v9 = vld [vmem:[%s1352_s3 + $0x38] sm:$0xff]   ;;  %v1003_v11 = vld [vmem:[%s1352_s3 + $0x30] sm:$0xff]   ;;  %vm577_vm4 = vcmask 130048   ;;  %vm740_vm5 = vcmask 261120  }
  0x16   : > { %900 = vmatpush3.bf16.msra.mxu1 %v407_v2  ;;  %894 = vmatpush3.bf16.msra.mxu0 %v336_v5  ;;  %s834_s26 = sshll.u32 %s1200_s23, 3  ;;  %v1004_v12 = vld [vmem:[%s1352_s3 + $0x28] sm:$0xff]   ;;  %v1005_v13 = vld [vmem:[%s1352_s3 + $0x20] sm:$0xff]   ;;  %v1006_v14 = vld [vmem:[%s1352_s3 + $0x18] sm:$0xff]   ;;  %vm742_vm6 = vcmask 523264   ;;  %s1308_s23 = scalar_lea.hbm %s1357_s8, %s864_s21 }
  0x17   : > { %901 = vmatprep.subr.bf16.mxu1 %v1083_v1  ;;  %909 = vmatprep.subr.bf16.mxu0 %v1083_v1  ;;  %s313_s13 = scalar_lea.vmem %s1349_s0, %s834_s26  ;;  %v1007_v15 = vld [vmem:[%s1352_s3 + $0x10] sm:$0xff]   ;;  %v1008_v16 = vld [vmem:[%s1352_s3 + $0x8] sm:$0xff]   ;;  %v1009_v17 = vld [vmem:[%s1352_s3] sm:$0xff]   ;;  %s317_s24 = scalar_lea.vmem %s1350_s1, %s834_s26 }
  0x18   : > { %v319_v7 = vld [vmem:[%s313_s13] sm:$0xff]  ;;  %v1011_v39 = vld [vmem:[%s1355_s6 + $0x38] sm:$0xff]   ;;  %v1012_v40 = vld [vmem:[%s1355_s6 + $0x30] sm:$0xff]   ;;  %s1088_s26 = smov [#allocation2]  }
  0x19   : > { %v325_v8 = vpack.c.bf16 %v319_v7, %v319_v7  ;;  %v837_v18 = vld [vmem:[%s1356_s7] ss:$0 sm:$0xff]  ;;  %v842_v31 = vld [vmem:[%s1356_s7 + $0x1] ss:$0 sm:$0xff]  ;;  %v1013_v42 = vld [vmem:[%s1355_s6 + $0x28] sm:$0xff]   ;;  %s1025_s13 = sshll.u32 %s1088_s26, 4  ;;  %s1026_s13 = int_to_ptr.vmem [resolvable:$false] %s1025_s13 }
  0x1a   : > { %902 = vmatpush3.bf16.msra.mxu1 %v1000_v3  ;;  %v1010_v30 = vld [vmem:[%s1353_s4] sm:$0xff]   ;;  %v1015_v44 = vld [vmem:[%s1355_s6 + $0x18] sm:$0xff]   ;;  %v1016_v45 = vld [vmem:[%s1355_s6 + $0x10] sm:$0xff]  }
  0x1b   : > { %903 = vmatprep.subr.bf16.mxu1 %v1083_v1  ;;  %328 = vrot.lane.b32.xlu0 %v325_v8, %s1085_s17  ;;  %v1014_v43 = vld [vmem:[%s1355_s6 + $0x20] sm:$0xff]   ;;  %v1017_v51 = vld [vmem:[%s1355_s6 + $0x8] sm:$0xff]   ;;  %s307_s17 = sand.u32 1, %s1073_s28  }
  0x1c   : > { %v320_v46 = vld [vmem:[%s317_s24] sm:$0xff]  ;;  %s745_s9 = scalar_lea.sflag [#allocation3], %s307_s17 }
  0x1d   : > { %v1018_v52 = vld [vmem:[%s1355_s6] sm:$0xff]  }
  0x1e   : > { %904 = vmatpush3.bf16.msra.mxu1 %v1001_v6  ;;  %v853_v53 = vld [vmem:[%s1356_s7 + $0x2] ss:$0 sm:$0xff]  ;;  %v854_v62 = vld [vmem:[%s1356_s7 + $0x3] ss:$0 sm:$0xff] }
  0x1f   : > { %935 = vmatprep.subr.bf16.mxu1 %v1083_v1 }
  0x21   : > { %906 = vmatmul.mubr.msk.bf16.vlgmr.msra.gmra.mxu1 %vm402_vm2, %v325_v8 }
  0x22   : > { %951 = vmatprep.mubr.msk.bf16.mxu1 %vm1084_vm1, %v1083_v1  ;;  %936 = vmatpush3.bf16.msra.mxu1 %v1011_v39 }
  0x23   : > { %937 = vmatprep.subr.bf16.mxu1 %v1083_v1 }
  0x26   : > { %938 = vmatpush3.bf16.msra.mxu1 %v1012_v40 }
  0x27   : > { %939 = vmatprep.subr.bf16.mxu1 %v1083_v1 }
  0x2a   : > { %940 = vmatpush3.bf16.msra.mxu1 %v1013_v42 }
  0x2b   : > { %941 = vmatprep.subr.bf16.mxu1 %v1083_v1 }
  0x2e   : > { %942 = vmatpush3.bf16.msra.mxu1 %v1014_v43 }
  0x2f   : > { %943 = vmatprep.subr.bf16.mxu1 %v1083_v1 }
  0x32   : > { %944 = vmatpush3.bf16.msra.mxu1 %v1015_v44 }
  0x33   : > { %945 = vmatprep.subr.bf16.mxu1 %v1083_v1 }
  0x36   : > { %946 = vmatpush3.bf16.msra.mxu1 %v1016_v45 }
  0x37   : > { %947 = vmatprep.subr.bf16.mxu1 %v1083_v1 }
  0x3a   : > { %948 = vmatpush3.bf16.msra.mxu1 %v1017_v51 }
  0x3b   : > { %949 = vmatprep.subr.bf16.mxu1 %v1083_v1 }
  0x3e   : > { %950 = vmatpush3.bf16.msra.mxu1 %v1018_v52 }
  0x8d   : > { %v329_v10 = vpop.permute.xlu0 %328 }
  0x8e   : > { %896 = vmatmul.mubr.msk.bf16.vlgmr.msra.gmra.mxu0 %vm330_vm3, %v329_v10 }
  0x8f   : > { %910 = vmatpush3.bf16.msra.mxu0 %v1002_v9  ;;  %925 = vmatprep.mubr.msk.bf16.mxu0 %vm1084_vm1, %v1083_v1 }
  0x90   : > { %911 = vmatprep.subr.bf16.mxu0 %v1083_v1 }
  0x93   : > { %912 = vmatpush3.bf16.msra.mxu0 %v1003_v11 }
  0x94   : > { %913 = vmatprep.subr.bf16.mxu0 %v1083_v1 }
  0x97   : > { %914 = vmatpush3.bf16.msra.mxu0 %v1004_v12 }
  0x98   : > { %915 = vmatprep.subr.bf16.mxu0 %v1083_v1 }
  0x9b   : > { %916 = vmatpush3.bf16.msra.mxu0 %v1005_v13 }
  0x9c   : > { %917 = vmatprep.subr.bf16.mxu0 %v1083_v1 }
  0x9f   : > { %918 = vmatpush3.bf16.msra.mxu0 %v1006_v14 }
  0xa0   : > { %919 = vmatprep.subr.bf16.mxu0 %v1083_v1 }
  0xa3   : > { %920 = vmatpush3.bf16.msra.mxu0 %v1007_v15 }
  0xa4   : > { %921 = vmatprep.subr.bf16.mxu0 %v1083_v1 }
  0xa7   : > { %922 = vmatpush3.bf16.msra.mxu0 %v1008_v16 }
  0xa8   : > { %923 = vmatprep.subr.bf16.mxu0 %v1083_v1 }
  0xab   : > { %924 = vmatpush3.bf16.msra.mxu0 %v1009_v17 }
  0xac   : > { %929 = vmatprep.subr.bf16.mxu0 %v1083_v1 }
  0xe1   : > { %v443_v19 = vpop.f32.mrf.mxu1 }
  0xe2   : > { %v444_v20 = vadd.f32 %v837_v18, %v443_v19 }
  0xe3   : > { %v907_v21 = vpop.f32.mrf.mxu1 }
  0xe4   : > { %v449_v22 = vmax.f32 %v444_v20, 0.0 }
  0xe5   : > { %v446_v23 = vpop.f32.mrf.mxu1 }
  0xe6   : > { %v450_v24 = vpack.c.bf16 %v449_v22, %v449_v22 }
  0xe7   : > { %v908_v25 = vpop.f32.mrf.mxu1 }
  0xe8   : > { %926 = vmatmul.mubr.bf16.vlgmr.msra.gmra.mxu0 %v450_v24 }
  0xe9   : > { %931 = vmatprep.mubr.msk.bf16.mxu0 %vm1084_vm1, %v1083_v1  ;;  %930 = vmatpush3.bf16.msra.mxu0 %v1010_v30 }
 0x14e   : > { %v372_v26 = vpop.f32.mrf.mxu0 }
 0x150   : > { %v897_v27 = vpop.f32.mrf.mxu0 }
 0x152   : > { %v375_v28 = vpop.f32.mrf.mxu0 }
 0x154   : > { %v898_v29 = vpop.f32.mrf.mxu0 }
 0x1a8   : > { %v553_v32 = vpop.f32.mrf.mxu0 }
 0x1a9   : > { %v554_v33 = vadd.f32 %v842_v31, %v553_v32 }
 0x1aa   : > { %v927_v34 = vpop.f32.mrf.mxu0 }
 0x1ab   : > { %v559_v35 = vmul.f32 0.5, %v554_v33  ;;  %737 = vrot.lane.b32.xlu1 %v554_v33, %s1086_s18  ;;  %s833_s18 = sshll.u32 %s307_s17, 3 }
 0x1ac   : > { %v556_v36 = vpop.f32.mrf.mxu0  ;;  %s309_s22 = scalar_lea.vmem [#allocation2], %s833_s18  ;;  %s1027_s18 = scalar_lea.vmem %s1026_s13, 256 }
 0x1ad   : > { %v560_v37 = vmul.f32 1.442695, %v559_v35  ;;  %s758_s24 = sshll.u32 %s309_s22, 4  ;;  %s1310_s24 = int_to_ptr.vmem [resolvable:$true] %s758_s24 }
 0x1ae   : > { %v928_v38 = vpop.f32.mrf.mxu0  ;;  %s1021_s12 = scalar_lea.vmem %s1310_s24, 128  ;;  %p1028_p0 = scmp.lt.s32.totalorder %s1310_s24, %s1026_s13 }
 0x1af   : > { %1019 = vpow2.f32 %v560_v37  ;;  %p1022_p11 = scmp.ne.s32.totalorder %s1310_s24, %s1021_s12  ;;  %p1029_p1 = scmp.lt.s32.totalorder %s1027_s18, %s1021_s12 }
 0x1b1   : > { %p1023_p12 = pnand %p1022_p11, %p1172_p5  ;;  %p1030_p2 = por %p1029_p1, %p1028_p0 }
 0x1b3   : > { %p1024_p13 = pneg %p1023_p12 }
 0x1b5   : > { %p1031_p3 = pnand %p1030_p2, %p1024_p13 }
 0x1bc   : > { %v1020_v41 = vpop.eup %1019 }
 0x1bd   : > { %563 = vrot.lane.b32.xlu0 %v1020_v41, %s1087_s10 }
 0x21d   : > { %v738_v1 = vpop.permute.xlu1 %737 }
 0x22f   : > { %v564_v47 = vpop.permute.xlu0 %563 }
 0x230   : > { %v566_v48 = vmul.f32 %v564_v47, %v320_v46 }
 0x232   : > { %v567_v49 = vadd.f32 %v566_v48, %v554_v33 }
 0x234   : > { %v568_v50 = vpack.c.bf16 %v567_v49, %v567_v49 }
 0x236   : > { %932 = vmatmul.mubr.msk.bf16.vlgmr.msra.gmra.mxu0 %vm577_vm4, %v568_v50 }
 0x2f6   : > { %v615_v54 = vpop.f32.mrf.mxu0 }
 0x2f7   : > { %v616_v55 = vadd.f32 %v615_v54, %v372_v26 }
 0x2f8   : > { %v933_v56 = vpop.f32.mrf.mxu0 }
 0x2f9   : > { %v625_v57 = vadd.f32 %v853_v53, %v616_v55 }
 0x2fa   : > { %v618_v58 = vpop.f32.mrf.mxu0 }
 0x2fb   : > { %v626_v59 = vmax.f32 %v625_v57, 0.0 }
 0x2fc   : > { %v934_v60 = vpop.f32.mrf.mxu0 }
 0x2fd   : > { %v627_v61 = vpack.c.bf16 %v626_v59, %v626_v59 }
 0x2ff   : > { %952 = vmatmul.mubr.bf16.vlgmr.msra.gmra.mxu1 %v627_v61 }
 0x3bf   : > { %v730_v63 = vpop.f32.mrf.mxu1 }
 0x3c0   : > { %v731_v0 = vadd.f32 %v854_v62, %v730_v63 }
 0x3c1   : > { %v953_v2 = vpop.f32.mrf.mxu1 }
 0x3c2   : > { %v741_v3 = vsel %vm740_vm5, %v731_v0, %v738_v1 }
 0x3c3   : > { %v733_v4 = vpop.f32.mrf.mxu1  ;;  %743 = vst.msk [vmem:[%s309_s22] sm:$0xff] %vm742_vm6, %v741_v3 }
 0x3c4   : > { %1034 = shalt.err (!%p1031_p3)
}
 0x3c5   : > { %s1035_s19 = scalar_lea.hbm %s1308_s23, 128  ;;  %s1039_s21 = scalar_lea.hbm %s1357_s8, 256 }
 0x3c6   : > { %p1036_p4 = scmp.ne.s32.totalorder %s1308_s23, %s1035_s19  ;;  %p1040_p9 = scmp.lt.s32.totalorder %s1308_s23, %s1357_s8 }
 0x3c7   : > { %p1041_p10 = scmp.lt.s32.totalorder %s1039_s21, %s1035_s19 }
 0x3c8   : > { %p1037_p7 = pnand %p1036_p4, %p1172_p5 }
 0x3c9   : > { %p1042_p11 = por %p1041_p10, %p1040_p9 }
 0x3ca   : > { %p1038_p8 = pneg %p1037_p7 }
 0x3cc   : > { %p1043_p12 = pnand %p1042_p11, %p1038_p8 }
 0x3ce   : > { %1046 = shalt.err (!%p1043_p12)
}
 0x3cf   : > { %955 = dma.vmem_to_hbm [thread:$0]  (%p1172_p5), %s1310_s24, 128, %s1308_s23, %s745_s9   ;;  %v954_v5 = vpop.f32.mrf.mxu1 }
 0x3d0 PF: > { %p961_p13 = scmp.ge.s32.totalorder %s1081_s30, 2  ;;  %s770_s10 = sand.u32 1, %s1069_s27  }
 0x3d1   : > { %s771_s12 = scalar_lea.sflag [#allocation3], %s770_s10 }
 0x3d2   : > { %p958_p0 = pnand %p961_p13, %p1176_p6 }
 0x3d4   : > { %p959_p1 = pneg %p958_p0 }
 0x3d6   : > { %1064 = dma.done.wait (%p959_p1), %s771_s12, 128  }
 0x3d7   : > { %1066 = vsyncadd (%p959_p1), %s771_s12, 4294967168  ;;  %p18_p2 = scmp.ge.s32.totalorder %s1159_s11, 4   ;;  %s1360_s27 = smov %s1073_s28 }
 0x3d8   : > { %s1361_s28 = smov %s1077_s29  ;;  %s1362_s29 = smov %s1170_s14 }
 0x3d9   : > { %s1363_s30 = smov %s1159_s11  ;;  %20 = sbr.rel (!%p18_p2) target bundleno = 3 (0x3), region = 90 }
 0x3de   :  { %776 = vsyncpa [#allocation3], 1 }
 0x3df   :  { %778 = vsyncpa [#allocation3 + $0x1], 1 }

</bundles_post_ra>
